<compile_context>
chip_gen: v6e
topology: v6e:2x2x1
jax: 0.10.0
libtpu: 0.0.40
codegen_flags: <defaults>
</compile_context>

<pallas_src>
import jax
import jax.numpy as jnp
from jax.experimental import pallas as pl
from jax.experimental.pallas import tpu as pltpu


def _round_up(x, m):
    return ((x + m - 1) // m) * m


def _make_ffn_kernel(tile_ff, resident_weights):
    def kernel(x_ref, w1_ref, b1_ref, w2_ref, b2_ref, o_ref, acc_ref):
        # x_ref : (tile_m, d_model)
        # w1_ref: (d_model, d_ff_pad) if resident else (d_model, tile_ff)
        # b1_ref: (1, d_ff_pad)   resident
        # w2_ref: (d_ff_pad, d_model) if resident else (tile_ff, d_model)
        # b2_ref: (1, d_model)    resident
        # o_ref : (tile_m, d_model)   acc_ref: (tile_m, d_model) f32 scratch
        k = pl.program_id(1)

        @pl.when(k == 0)
        def _init():
            # Seed the accumulator with b2 (saves one full VPU add pass per m tile).
            acc_ref[...] = jnp.broadcast_to(
                b2_ref[...].astype(jnp.float32), acc_ref.shape)

        off = pl.multiple_of(k * tile_ff, 128)
        if resident_weights:
            # Full W1/W2 live in VMEM once; slice the current d_ff chunk.
            w1 = w1_ref[:, pl.ds(off, tile_ff)]
            w2 = w2_ref[pl.ds(off, tile_ff), :]
        else:
            w1 = w1_ref[...]
            w2 = w2_ref[...]
        b1c = b1_ref[:, pl.ds(off, tile_ff)]

        # First matmul + bias + ReLU on this d_ff chunk (f32 accumulation on MXU).
        h = jnp.dot(x_ref[...], w1, preferred_element_type=jnp.float32)
        h = jnp.maximum(h + b1c.astype(jnp.float32), 0.0)

        # Second matmul: cast h to the weight dtype (bf16 fast path when weights
        # are bf16), accumulate the partial product into the resident f32 acc.
        acc_ref[...] += jnp.dot(h.astype(w2.dtype), w2,
                                preferred_element_type=jnp.float32)

        @pl.when(k == pl.num_programs(1) - 1)
        def _finalize():
            o_ref[...] = acc_ref[...].astype(o_ref.dtype)

    return kernel


def _vmem_estimate(tile_m, tile_ff, d_model, d_ff_pad, isz_c, isz_out, resident):
    est = 2 * tile_m * d_model * isz_c               # x tile (double-buffered)
    est += 2 * tile_m * d_model * isz_out            # out tile (double-buffered)
    est += tile_m * d_model * 4                      # f32 accumulator scratch
    est += tile_m * tile_ff * 4                      # live h intermediate (f32)
    if resident:
        est += 2 * d_model * d_ff_pad * isz_c        # W1 + W2 resident (1 copy each)
    else:
        est += 2 * 2 * d_model * tile_ff * isz_c     # W1 + W2 chunks (double-buffered)
    est += 4 * (d_ff_pad + d_model)                  # f32 biases, resident
    return est


def position_wise_feed_forward(x, w1_t, b1, w2_t, b2, *, tile_m=None, tile_ff=None,
                               compute_dtype=None, weights_resident=None):
    """y = relu(x @ w1_t + b1) @ w2_t + b2.

    x    : (..., d_model)
    w1_t : (d_model, d_ff)   -- fc1.weight.T (pre-transposed ONCE outside this call)
    b1   : (d_ff,)
    w2_t : (d_ff, d_model)   -- fc2.weight.T (pre-transposed ONCE outside this call)
    b2   : (d_model,)
    compute_dtype : optional (e.g. jnp.bfloat16) dtype for the matmul operands.
        Accumulation + biases stay f32 and the output keeps x's original dtype.
        bf16 gives ~3-6x MXU throughput and halves HBM traffic but will not match
        a pure-f32 reference at 1e-4.
    """
    *lead, d_model = x.shape
    d_ff = w1_t.shape[1]
    assert w1_t.shape == (d_model, d_ff)
    assert w2_t.shape == (d_ff, d_model)
    assert b1.shape == (d_ff,) and b2.shape == (d_model,)

    out_dtype = x.dtype
    if compute_dtype is not None:
        x = x.astype(compute_dtype)
        w1_t = w1_t.astype(compute_dtype)
        w2_t = w2_t.astype(compute_dtype)
    b1_2d = b1.reshape(1, d_ff).astype(jnp.float32)
    b2_2d = b2.reshape(1, d_model).astype(jnp.float32)

    M = 1
    for s in lead:
        M *= s
    x2d = x.reshape(M, d_model)

    isz_c = jnp.dtype(x2d.dtype).itemsize
    isz_out = jnp.dtype(out_dtype).itemsize
    sublane = 16 if isz_c == 2 else 8

    # --- chip-aware VMEM budget (v7x has 64 MiB per TC, v5e/v6e 128 MiB) ---------
    try:
        chip_vmem = int(getattr(pltpu.get_tpu_info(), "vmem_capacity_bytes",
                                64 << 20))
    except Exception:
        chip_vmem = 64 << 20                         # conservative fallback
    vmem_cap = max(32 << 20, min(chip_vmem - (8 << 20), 120 << 20))
    vmem_budget = max(24 << 20, min(int(chip_vmem * 0.70), 100 << 20))

    # --- d_ff (reduction) tiling: zero-pad to a multiple of tile_ff --------------
    if tile_ff is None:
        tile_ff = min(512, _round_up(d_ff, 128))     # 128-aligned chunks feed MXU
    tile_ff = max(128, _round_up(tile_ff, 128))
    k_tiles = pl.cdiv(d_ff, tile_ff)
    d_ff_pad = k_tiles * tile_ff
    if d_ff_pad != d_ff:
        # Zero padding is exact: relu(x@0 + 0) = 0 and 0 @ W2_pad = 0.
        w1_t = jnp.pad(w1_t, ((0, 0), (0, d_ff_pad - d_ff)))
        w2_t = jnp.pad(w2_t, ((0, d_ff_pad - d_ff), (0, 0)))
        b1_2d = jnp.pad(b1_2d, ((0, 0), (0, d_ff_pad - d_ff)))

    # --- M (row) tiling -----------------------------------------------------------
    if tile_m is None:
        tile_m = 1024 if isz_c <= 2 else 512          # amortize weight streaming
        # Ensure >= 2 m tiles so both v7x TensorCores get work for small M.
        tile_m = min(tile_m, max(sublane, _round_up(pl.cdiv(M, 2), sublane)))
    tile_m = max(sublane, _round_up(tile_m, sublane))

    # --- weight residency + VMEM-driven tile_m shrink -----------------------------
    if weights_resident is None:
        weights_resident = _vmem_estimate(tile_m, tile_ff, d_model, d_ff_pad,
                                          isz_c, isz_out, True) <= vmem_budget
    while (_vmem_estimate(tile_m, tile_ff, d_model, d_ff_pad, isz_c, isz_out,
                          weights_resident) > vmem_budget and tile_m > sublane):
        tile_m = max(sublane, _round_up(tile_m // 2, sublane))

    m_tiles = pl.cdiv(M, tile_m)
    m_pad = m_tiles * tile_m
    if m_pad != M:
        # Padded rows compute garbage independently of real rows; sliced off below.
        x2d = jnp.pad(x2d, ((0, m_pad - M), (0, 0)))

    # --- specs --------------------------------------------------------------------
    vmem_full = pl.BlockSpec(memory_space=pltpu.MemorySpace.VMEM)
    if weights_resident:
        w1_spec = vmem_full                           # fetched from HBM exactly once
        w2_spec = vmem_full
    else:
        w1_spec = pl.BlockSpec((d_model, tile_ff), lambda i, k: (0, k))
        w2_spec = pl.BlockSpec((tile_ff, d_model), lambda i, k: (k, 0))

    est = _vmem_estimate(tile_m, tile_ff, d_model, d_ff_pad, isz_c, isz_out,
                         weights_resident)
    vmem_limit = min(max(int(est * 1.4) + (2 << 20), 32 << 20), vmem_cap)

    weight_reads = 1 if weights_resident else m_tiles
    cost = pl.CostEstimate(
        flops=4 * m_pad * d_model * d_ff_pad,         # two matmuls
        transcendentals=0,
        bytes_accessed=(m_pad * d_model * (isz_c + isz_out)
                        + weight_reads * 2 * d_model * d_ff_pad * isz_c
                        + 4 * (d_ff_pad + d_model)),
    )

    out2d = pl.pallas_call(
        _make_ffn_kernel(tile_ff, weights_resident),
        out_shape=jax.ShapeDtypeStruct((m_pad, d_model), out_dtype),
        grid_spec=pltpu.PrefetchScalarGridSpec(
            num_scalar_prefetch=0,
            grid=(m_tiles, k_tiles),                  # reduction axis last
            in_specs=[
                pl.BlockSpec((tile_m, d_model), lambda i, k: (i, 0)),   # x tile
                w1_spec,                                                 # W1
                vmem_full,                                               # b1 resident
                w2_spec,                                                 # W2
                vmem_full,                                               # b2 resident
            ],
            out_specs=pl.BlockSpec((tile_m, d_model), lambda i, k: (i, 0)),
            scratch_shapes=[pltpu.VMEM((tile_m, d_model), jnp.float32)],
        ),
        compiler_params=pltpu.CompilerParams(
            dimension_semantics=("parallel", "arbitrary"),
            vmem_limit_bytes=vmem_limit,
        ),
        cost_estimate=cost,
    )(x2d, w1_t, b1_2d, w2_t, b2_2d)

    if m_pad != M:
        out2d = out2d[:M]
    return out2d.reshape(*lead, d_model)


if __name__ == "__main__":
    # d_model is a multiple of 128 (lane-dense stores); seq=9 exercises the padded
    # last M tile; d_ff=320 exercises d_ff zero-padding and (below) multi-chunk k.
    batch, seq, d_model, d_ff = 2, 9, 128, 320

    key = jax.random.PRNGKey(0)
    kx, kw1, kb1, kw2, kb2 = jax.random.split(key, 5)

    x = jax.random.normal(kx, (batch, seq, d_model), dtype=jnp.float32)

    # nn.Linear parameter shapes: fc1.weight (d_ff, d_model), fc2.weight (d_model, d_ff).
    lim1 = 1.0 / (d_model ** 0.5)
    lim2 = 1.0 / (d_ff ** 0.5)
    w1 = jax.random.uniform(kw1, (d_ff, d_model), jnp.float32, -lim1, lim1)
    b1 = jax.random.uniform(kb1, (d_ff,), jnp.float32, -lim1, lim1)
    w2 = jax.random.uniform(kw2, (d_model, d_ff), jnp.float32, -lim2, lim2)
    b2 = jax.random.uniform(kb2, (d_model,), jnp.float32, -lim2, lim2)

    # One-time layout conversion (lives outside the per-call / jit path).
    w1_t = jnp.asarray(w1.T)   # (d_model, d_ff)
    w2_t = jnp.asarray(w2.T)   # (d_ff, d_model)

    # Pure-JAX reference: fc2(relu(fc1(x))).
    ref = jnp.maximum(x @ w1.T + b1, 0.0) @ w2.T + b2

    # 1) Default config: weights fully resident in VMEM, auto tile sizes.
    out = jax.block_until_ready(position_wise_feed_forward(x, w1_t, b1, w2_t, b2))
    assert out.shape == (batch, seq, d_model)
    assert jnp.allclose(out, ref, atol=2e-4, rtol=2e-4), \
        float(jnp.max(jnp.abs(out - ref)))

    # 2) Streamed-weight path + small tiles: exercises the d_ff reduction axis
    #    (k_tiles=3), d_ff zero padding, and padded last M tile.
    out2 = jax.block_until_ready(position_wise_feed_forward(
        x, w1_t, b1, w2_t, b2, tile_m=8, tile_ff=128, weights_resident=False))
    assert jnp.allclose(out2, ref, atol=2e-4, rtol=2e-4), \
        float(jnp.max(jnp.abs(out2 - ref)))

    # 3) bf16 matmuls with f32 accumulation (production fast path): loose tolerance.
    out3 = jax.block_until_ready(position_wise_feed_forward(
        x, w1_t, b1, w2_t, b2, compute_dtype=jnp.bfloat16))
    assert out3.dtype == x.dtype and out3.shape == ref.shape
    assert jnp.allclose(out3, ref, atol=1e-1, rtol=1e-1), \
        float(jnp.max(jnp.abs(out3 - ref)))

    print("KERNEL_OK")
</pallas_src>

<mosaic_0001>
module attributes {stable_mosaic.version = 11 : i64} {
  func.func @kernel(%arg0: i32, %arg1: i32, %arg2: memref<16x128xf32, #tpu.memory_space<vmem>>, %arg3: memref<128x384xf32, #tpu.memory_space<vmem>>, %arg4: memref<1x384xf32, #tpu.memory_space<vmem>>, %arg5: memref<384x128xf32, #tpu.memory_space<vmem>>, %arg6: memref<1x128xf32, #tpu.memory_space<vmem>>, %arg7: memref<16x128xf32, #tpu.memory_space<vmem>>, %arg8: memref<16x128xf32, #tpu.memory_space<vmem>>) attributes {dimension_semantics = [#tpu.dimension_semantics<parallel>, #tpu.dimension_semantics<arbitrary>], iteration_bounds = array<i64: 2, 1>, scalar_prefetch = 0 : i64, scratch_operands = 1 : i64, tpu.core_type = #tpu.core_type<tc>, window_params = [{transform_indices = @transform_0, window_bounds = array<i64: 16, 128>}, {pipeline_mode = #tpu.pipeline_mode<synchronous>, transform_indices = @transform_1, window_bounds = array<i64: 128, 384>}, {pipeline_mode = #tpu.pipeline_mode<synchronous>, transform_indices = @transform_2, window_bounds = array<i64: 1, 384>}, {pipeline_mode = #tpu.pipeline_mode<synchronous>, transform_indices = @transform_3, window_bounds = array<i64: 384, 128>}, {pipeline_mode = #tpu.pipeline_mode<synchronous>, transform_indices = @transform_4, window_bounds = array<i64: 1, 128>}, {transform_indices = @transform_5, window_bounds = array<i64: 16, 128>}]} {
    %c0_i32 = arith.constant 0 : i32
    %0 = arith.cmpi eq, %arg1, %c0_i32 : i32
    %1 = arith.extui %0 : i1 to i32
    %c0_i32_0 = arith.constant 0 : i32
    %2 = arith.cmpi ne, %1, %c0_i32_0 : i32
    scf.if %2 {
      %c0_13 = arith.constant 0 : index
      %c0_14 = arith.constant 0 : index
      %24 = vector.load %arg6[%c0_13, %c0_14] : memref<1x128xf32, #tpu.memory_space<vmem>>, vector<1x128xf32>
      %25 = vector.shape_cast %24 : vector<1x128xf32> to vector<1x128xf32>
      %26 = vector.broadcast %25 : vector<1x128xf32> to vector<16x128xf32>
      %c0_15 = arith.constant 0 : index
      %c0_16 = arith.constant 0 : index
      %27 = vector.load %arg8[%c0_15, %c0_16] : memref<16x128xf32, #tpu.memory_space<vmem>>, vector<16x128xf32>
      tpu.vector_store %arg8[%c0_15, %c0_16], %26 {strides = array<i32>} : memref<16x128xf32, #tpu.memory_space<vmem>>, vector<16x128xf32>,
    } else {
    }
    %c384_i32 = arith.constant 384 : i32
    %3 = arith.muli %arg1, %c384_i32 : i32
    %4 = tpu.assume_multiple %3, 128 : i32
    %c0 = arith.constant 0 : index
    %5 = arith.index_cast %4 : i32 to index
    %6 = vector.load %arg3[%c0, %5] : memref<128x384xf32, #tpu.memory_space<vmem>>, vector<128x384xf32>
    %7 = arith.index_cast %4 : i32 to index
    %c0_1 = arith.constant 0 : index
    %8 = vector.load %arg5[%7, %c0_1] : memref<384x128xf32, #tpu.memory_space<vmem>>, vector<384x128xf32>
    %c0_2 = arith.constant 0 : index
    %9 = arith.index_cast %4 : i32 to index
    %10 = vector.load %arg4[%c0_2, %9] : memref<1x384xf32, #tpu.memory_space<vmem>>, vector<1x384xf32>
    %c0_3 = arith.constant 0 : index
    %c0_4 = arith.constant 0 : index
    %11 = vector.load %arg2[%c0_3, %c0_4] : memref<16x128xf32, #tpu.memory_space<vmem>>, vector<16x128xf32>
    %cst = arith.constant dense<0.000000e+00> : vector<16x384xf32>
    %12 = tpu.matmul %11, %6, %cst {dimension_numbers = #tpu.dot_dimension_numbers<[1], [0], [0], [1], [0, 0, 1, 1], [], []>} : vector<16x128xf32>, vector<128x384xf32>, vector<16x384xf32> -> vector<16x384xf32>
    %13 = vector.broadcast %10 : vector<1x384xf32> to vector<16x384xf32>
    %14 = arith.addf %12, %13 : vector<16x384xf32>
    %cst_5 = arith.constant 0.000000e+00 : f32
    %15 = vector.broadcast %cst_5 : f32 to vector<16x384xf32>
    %16 = arith.maximumf %14, %15 : vector<16x384xf32>
    %c0_6 = arith.constant 0 : index
    %c0_7 = arith.constant 0 : index
    %17 = vector.load %arg8[%c0_6, %c0_7] : memref<16x128xf32, #tpu.memory_space<vmem>>, vector<16x128xf32>
    %cst_8 = arith.constant dense<0.000000e+00> : vector<16x128xf32>
    %18 = tpu.matmul %16, %8, %cst_8 {dimension_numbers = #tpu.dot_dimension_numbers<[1], [0], [0], [1], [0, 0, 1, 1], [], []>} : vector<16x384xf32>, vector<384x128xf32>, vector<16x128xf32> -> vector<16x128xf32>
    %19 = arith.addf %17, %18 : vector<16x128xf32>
    %c0_9 = arith.constant 0 : index
    %c0_10 = arith.constant 0 : index
    %20 = vector.load %arg8[%c0_9, %c0_10] : memref<16x128xf32, #tpu.memory_space<vmem>>, vector<16x128xf32>
    tpu.vector_store %arg8[%c0_9, %c0_10], %19 {strides = array<i32>} : memref<16x128xf32, #tpu.memory_space<vmem>>, vector<16x128xf32>,
    %c0_i32_11 = arith.constant 0 : i32
    %21 = arith.cmpi eq, %arg1, %c0_i32_11 : i32
    %22 = arith.extui %21 : i1 to i32
    %c0_i32_12 = arith.constant 0 : i32
    %23 = arith.cmpi ne, %22, %c0_i32_12 : i32
    scf.if %23 {
      %c0_13 = arith.constant 0 : index
      %c0_14 = arith.constant 0 : index
      %24 = vector.load %arg8[%c0_13, %c0_14] : memref<16x128xf32, #tpu.memory_space<vmem>>, vector<16x128xf32>
      %c0_15 = arith.constant 0 : index
      %c0_16 = arith.constant 0 : index
      %25 = vector.load %arg7[%c0_15, %c0_16] : memref<16x128xf32, #tpu.memory_space<vmem>>, vector<16x128xf32>
      tpu.vector_store %arg7[%c0_15, %c0_16], %24 {strides = array<i32>} : memref<16x128xf32, #tpu.memory_space<vmem>>, vector<16x128xf32>,
    } else {
    }
    return
  }
  func.func @transform_0(%arg0: i32, %arg1: i32) -> (i32, i32) {
    %c0_i32 = arith.constant 0 : i32
    %c0_i32_0 = arith.constant 0 : i32
    return %arg0, %c0_i32 : i32, i32
  }
  func.func @transform_1(%arg0: i32, %arg1: i32) -> (i32, i32) {
    %c0_i32 = arith.constant 0 : i32
    %c0_i32_0 = arith.constant 0 : i32
    %c0_i32_1 = arith.constant 0 : i32
    return %c0_i32, %c0_i32_0 : i32, i32
  }
  func.func @transform_2(%arg0: i32, %arg1: i32) -> (i32, i32) {
    %c0_i32 = arith.constant 0 : i32
    %c0_i32_0 = arith.constant 0 : i32
    %c0_i32_1 = arith.constant 0 : i32
    return %c0_i32, %c0_i32_0 : i32, i32
  }
  func.func @transform_3(%arg0: i32, %arg1: i32) -> (i32, i32) {
    %c0_i32 = arith.constant 0 : i32
    %c0_i32_0 = arith.constant 0 : i32
    %c0_i32_1 = arith.constant 0 : i32
    return %c0_i32, %c0_i32_0 : i32, i32
  }
  func.func @transform_4(%arg0: i32, %arg1: i32) -> (i32, i32) {
    %c0_i32 = arith.constant 0 : i32
    %c0_i32_0 = arith.constant 0 : i32
    %c0_i32_1 = arith.constant 0 : i32
    return %c0_i32, %c0_i32_0 : i32, i32
  }
  func.func @transform_5(%arg0: i32, %arg1: i32) -> (i32, i32) {
    %c0_i32 = arith.constant 0 : i32
    %c0_i32_0 = arith.constant 0 : i32
    return %arg0, %c0_i32 : i32, i32
  }
}

</mosaic_0001>

<bundles_post_ra>
// kernel: tpu_custom_call.1
= control target key start
LH: loop header
LB: loop body
LE: loop exit
PB: predicated region body
PF: predicated region fallthrough
CT: control target
= control target key end

     0   :  { %s1534_s0 = inlined_call_operand.hbm [shape: f32[32,128], index: 0, kind: input, shape index: {}]   ;;  %s1535_s1 = inlined_call_operand.hbm [shape: f32[128,384], index: 1, kind: input, shape index: {}]   ;;  %s1536_s2 = inlined_call_operand.vmem [shape: f32[1,384], index: 2, kind: input, shape index: {}]   ;;  %s1537_s3 = inlined_call_operand.hbm [shape: f32[384,128], index: 3, kind: input, shape index: {}]   ;;  %s1538_s4 = inlined_call_operand.vmem [shape: f32[1,128], index: 4, kind: input, shape index: {}]   ;;  %s1539_s5 = inlined_call_operand.hbm [shape: f32[32,128], index: 5, kind: output, shape index: {}]  }
   0x1   :  { %1545 = sst [smem:[#allocation13_spill]] %s1535_s1 }
   0x2   :  { %10 = vsyncpa [#allocation4], 0 }
   0x3   :  { %12 = vsyncpa [#allocation4 + $0x1], 0 }
   0x4   :  { %13 = vsyncpa [#allocation7], 0 }
   0x5   :  { %14 = vsyncpa [#allocation5], 0 }
   0x6   :  { %16 = vsyncpa [#allocation5 + $0x1], 0  ;;  %s1324_s18 = smov 0   ;;  %s1326_s19 = smov 0  }
   0x7   :  { %s1328_s20 = smov 0   ;;  %s1330_s21 = smov 0  }
   0x8   :  { %s1332_s22 = smov 0   ;;  %s1334_s23 = smov 0  }
   0x9 LB: > { %s861_s24 = sadd.s32 4294967295, %s1281_s23   ;;  %s862_s25 = sadd.s32 4294967294, %s1281_s23   ;;  %s1281_s23 = sphi %s1334_s23, %s22_s23   ;;  %s1277_s22 = sphi %s1332_s22, %s1565_s22   ;;  %s1273_s21 = sphi %s1330_s21, %s1564_s21   ;;  %s1269_s20 = sphi %s1328_s20, %s1563_s20   ;;  %s1265_s19 = sphi %s1326_s19, %s1562_s19   ;;  %s1261_s18 = sphi %s1324_s18, %s1561_s18  }
   0xa   : > { %p54_p0 = scmp.ne.s32.totalorder %s1265_s19, %s1261_s18  ;;  %p1358_p1 = scmp.eq.s32.totalorder %s861_s24, 0 }
   0xb   : > { %p1362_p2 = scmp.eq.s32.totalorder %s861_s24, 1  ;;  %p168_p3 = scmp.eq.s32.totalorder %s862_s25, 1 }
   0xc   : > { %s1546_s26 = scalar_select %p1358_p1, 1, 0 }
   0xd   : > { %p1368_p4 = por %p1358_p1, %p54_p0  ;;  %p863_p5 = scmp.ge.s32.totalorder %s1281_s23, 1 }
   0xe   : > { %p1373_p6 = por %p168_p3, %p54_p0  ;;  %p175_p7 = scmp.lt.s32.totalorder %s1281_s23, 3 }
   0xf   : > { %s1548_s28 = scalar_select %p1368_p4, 1, 0 }
  0x10   : > { %s1549_s29 = scalar_select %p1373_p6, 1, 0 }
  0x11   : > { %p1378_p8 = pnand %p863_p5, %p175_p7  ;;  %s1283_s6 = smov [#allocation6]  }
  0x12   : > { %s187_s7 = sshll.u32 %s1283_s6, 4  ;;  %s1284_s9 = smov [#allocation8]   ;;  %s188_s7 = int_to_ptr.vmem [resolvable:$true] %s187_s7 }
  0x13   : > { %p1039_p9 = pneg %p1378_p8  ;;  %s203_s10 = sshll.u32 %s1284_s9, 4  ;;  %s204_s10 = int_to_ptr.vmem [resolvable:$true] %s203_s10 }
  0x14   : > { %s1128_s11 = scalar_lea.vmem %s188_s7, 6144  ;;  %p1136_p5 = scmp.lt.s32.totalorder %s188_s7, %s188_s7 }
  0x15   : > { %p1387_p11 = pnand %p1039_p9, %p1358_p1  ;;  %p1129_p13 = scmp.ne.s32.totalorder %s188_s7, %s1128_s11 }
  0x16   : > { %p1137_p7 = scmp.lt.s32.totalorder %s1128_s11, %s1128_s11 }
  0x17   : > { %p1119_p12 = pneg %p1387_p11 }
  0x18   : > { %p1138_p10 = por %p1137_p7, %p1136_p5 }
  0x19   : > { %p1131_p0 = pnand %p1129_p13, %p1119_p12 }
  0x1b   : > { %p1132_p3 = pneg %p1131_p0 }
  0x1d   : > { %p1139_p9 = pnand %p1138_p10, %p1132_p3 }
  0x1f   : > { %1142 = shalt.err (!%p1139_p9)
}
  0x20   : > { %s1285_s12 = smov 384   ;;  %s1286_s13 = smov 24  }
  0x21   : > { %s1552_s1 = sld [smem:[#allocation13_spill]]  ;;  %s1154_s16 = scalar_lea.vmem %s204_s10, 6144 }
  0x22   : > { %p1155_p6 = scmp.ne.s32.totalorder %s204_s10, %s1154_s16  ;;  %p1162_p1 = scmp.lt.s32.totalorder %s204_s10, %s204_s10 }
  0x23   : > { %p1163_p4 = scmp.lt.s32.totalorder %s1154_s16, %s1154_s16 }
  0x24   : > { %p1157_p13 = pnand %p1155_p6, %p1119_p12 }
  0x25   : > { %p1164_p5 = por %p1163_p4, %p1162_p1 }
  0x26   : > { %p1158_p0 = pneg %p1157_p13 }
  0x27   : > { %1042 = dma.hbm_to_vmem [thread:$0]  (!%p1387_p11), %s1552_s1, 6144, %s188_s7, [#allocation7], %s1285_s12, %s1285_s12, %s1286_s13  }
  0x28   : > { %p1165_p10 = pnand %p1164_p5, %p1158_p0 }
  0x2a   : > { %1168 = shalt.err (!%p1165_p10)
}
  0x2b   : > { %s1543_s17 = smov 128   ;;  %s1544_s24 = smov 8  }
  0x2c   : > { %1045 = dma.hbm_to_vmem [thread:$0]  (!%p1387_p11), %s1537_s3, 6144, %s204_s10, [#allocation7], %s1543_s17, %s1543_s17, %s1544_s24  }
  0x2d   : > { %s34_s7 = sadd.s32 1, %s1277_s22  ;;  %s41_s9 = sadd.s32 1, %s1269_s20 }
  0x2e   : > { %p36_p1 = scmp.ge.s32.totalorder %s34_s7, 2  ;;  %p48_p4 = scmp.ne.s32.totalorder %s1269_s20, %s1265_s19 }
  0x2f   : > { %p49_p6 = scmp.eq.s32.totalorder %s1281_s23, 0  ;;  %p1056_p12 = scmp.lt.s32.totalorder %s1281_s23, 2 }
  0x30   : > { %s1567_s7 = smov (%p36_p1, %s34_s7), 0  ;;  %p1422_p7 = por %p1362_p2, %p48_p4 }
  0x31   : > { %p50_p3 = por %p49_p6, %p48_p4  ;;  %s38_s11 = ssub.s32 %s1277_s22, %s1567_s7 }
  0x32   : > { %s220_s12 = sand.u32 1, %s1269_s20   ;;  %p39_p9 = scmp.eq.s32.totalorder %s38_s11, 0 }
  0x33   : > { %s867_s10 = sshll.u32 %s220_s12, 4  ;;  %s881_s13 = sshll.u32 %s1277_s22, 8 }
  0x34   : > { %s1431_s14 = scalar_select %p39_p9, %s1269_s20, %s41_s9  }
  0x35   : > { %s230_s25 = scalar_lea.hbm %s1534_s0, %s881_s13  ;;  %s224_s6 = scalar_lea.vmem [#allocation3], %s867_s10 }
  0x36   : > { %s231_s17 = sshll.u32 %s224_s6, 4  ;;  %p1438_p11 = pnand %p1056_p12, %p50_p3  ;;  %s232_s17 = int_to_ptr.vmem [resolvable:$true] %s231_s17 }
  0x37   : > { %s221_s24 = scalar_lea.sflag [#allocation4], %s220_s12  ;;  %s1182_s11 = scalar_lea.vmem %s232_s17, 256 }
  0x38   : > { %p1171_p2 = pneg %p1438_p11  ;;  %p1183_p13 = scmp.ne.s32.totalorder %s232_s17, %s1182_s11 }
  0x39   : > { %s1289_s9 = smov [#allocation3]  }
  0x3a   : > { %p1185_p0 = pnand %p1183_p13, %p1171_p2  ;;  %s1187_s1 = sshll.u32 %s1289_s9, 4  ;;  %s1188_s1 = int_to_ptr.vmem [resolvable:$false] %s1187_s1 }
  0x3b   : > { %s1189_s13 = scalar_lea.vmem %s1188_s1, 512  ;;  %p1190_p10 = scmp.lt.s32.totalorder %s232_s17, %s1188_s1 }
  0x3c   : > { %p1186_p5 = pneg %p1185_p0  ;;  %p1191_p1 = scmp.lt.s32.totalorder %s1189_s13, %s1182_s11 }
  0x3e   : > { %p1192_p4 = por %p1191_p1, %p1190_p10 }
  0x40   : > { %p1193_p6 = pnand %p1192_p4, %p1186_p5 }
  0x42   : > { %1196 = shalt.err (!%p1193_p6)
}
  0x43   : > { %s1555_s10 = smov 8   ;;  %s1556_s15 = smov 128  }
  0x44   : > { %1049 = dma.hbm_to_vmem [thread:$0]  (!%p1438_p11), %s230_s25, 256, %s232_s17, %s221_s24, %s1556_s15, %s1556_s15, %s1555_s10  }
  0x45   : > { %243 = sbr.rel (%p1378_p8) target bundleno = 530 (0x212), region = 40  ;;  %s1452_s12 = sand.u32 (!%p1378_p8), 1, %s1265_s19  }
  0x46   : > { %s871_s1 = sshll.u32 (!%p1378_p8), %s1452_s12, 4  ;;  %s246_s16 = scalar_lea.sflag (!%p1378_p8), [#allocation4], %s1452_s12 }
  0x47   : > { %s1458_s6 = scalar_lea.vmem (!%p1378_p8), [#allocation3], %s871_s1  ;;  %p1557_p12 = scmp.ne.s32.totalorder (!%p1378_p8), %s1548_s28, 0 }
  0x4a   : > { %1248 = dma.done.wait (%p1557_p12), %s246_s16, 256  }
  0x4b   : > { %1250 = vsyncadd (%p1557_p12), %s246_s16, 4294967040  ;;  %p1558_p3 = scmp.ne.s32.totalorder %s1546_s26, 0 }
  0x4d   : > { %1252 = dma.done.wait (%p1558_p3), [#allocation7], 12288  }
  0x4e   : > { %1254 = vsyncadd (%p1558_p3), [#allocation7], 4294955008  ;;  %v1290_v0 = vmov 0.0   ;;  %v350_v1 = vld [vmem:[#allocation6 + $0x170] sm:$0xff]  ;;  %v349_v2 = vld [vmem:[#allocation6 + $0x168] sm:$0xff]  ;;  %s283_s24 = scalar_lea.vmem [#allocation9], %s871_s1 }
  0x4f   : > { %485 = vmatprep.mubr.f32.mxu0 %v1290_v0  ;;  %v351_v3 = vld [vmem:[#allocation6 + $0x178] sm:$0xff]  ;;  %421 = vmatprep.subr.mxu0 %v350_v1  ;;  %v346_v5 = vld [vmem:[#allocation6 + $0x150] sm:$0xff]  ;;  %v348_v6 = vld [vmem:[#allocation6 + $0x160] sm:$0xff]  ;;  %s756_s25 = sshll.u32 %s283_s24, 4  ;;  %s882_s27 = sshll.u32 %s1273_s21, 8  ;;  %s1481_s25 = int_to_ptr.vmem [resolvable:$true] %s756_s25 }
  0x50   : > { %957 = vmatprep.subr.mxu1 %v351_v3  ;;  %v347_v4 = vld [vmem:[#allocation6 + $0x158] sm:$0xff]  ;;  %422 = vmatpush1.msra.mxu0 %v349_v2  ;;  %v344_v7 = vld [vmem:[#allocation6 + $0x140] sm:$0xff]  ;;  %v345_v8 = vld [vmem:[#allocation6 + $0x148] sm:$0xff]  ;;  %s1486_s13 = scalar_lea.hbm %s1539_s5, %s882_s27  ;;  %s743_s10 = scalar_lea.sflag [#allocation5], %s1452_s12 }
  0x51   : > { %958 = vmatpush3.msra.mxu1 %v351_v3  ;;  %423 = vmatprep.subr.mxu0 %v347_v4  ;;  %v343_v9 = vld [vmem:[#allocation6 + $0x138] sm:$0xff]  ;;  %v341_v10 = vld [vmem:[#allocation6 + $0x128] sm:$0xff]  ;;  %v342_v11 = vld [vmem:[#allocation6 + $0x130] sm:$0xff]  ;;  %s1197_s15 = scalar_lea.vmem %s1481_s25, 256  ;;  %s1291_s21 = smov [#allocation9]  }
  0x52   : > { %959 = vmatprep.subr.mxu1 %v348_v6  ;;  %424 = vmatpush1.msra.mxu0 %v346_v5  ;;  %v340_v12 = vld [vmem:[#allocation6 + $0x120] sm:$0xff]  ;;  %v338_v13 = vld [vmem:[#allocation6 + $0x110] sm:$0xff]  ;;  %v339_v14 = vld [vmem:[#allocation6 + $0x118] sm:$0xff]  ;;  %p1198_p8 = scmp.ne.s32.totalorder %s1481_s25, %s1197_s15  ;;  %s1201_s1 = sshll.u32 %s1291_s21, 4  ;;  %s1202_s1 = int_to_ptr.vmem [resolvable:$false] %s1201_s1 }
  0x53   : > { %960 = vmatpush3.msra.mxu1 %v348_v6  ;;  %425 = vmatprep.subr.mxu0 %v344_v7  ;;  %v337_v15 = vld [vmem:[#allocation6 + $0x108] sm:$0xff]  ;;  %v335_v16 = vld [vmem:[#allocation6 + $0xf8] sm:$0xff]  ;;  %v336_v17 = vld [vmem:[#allocation6 + $0x100] sm:$0xff]  ;;  %s1203_s16 = scalar_lea.vmem %s1202_s1, 512  ;;  %p1204_p2 = scmp.lt.s32.totalorder %s1481_s25, %s1202_s1 }
  0x54   : > { %961 = vmatprep.subr.mxu1 %v345_v8  ;;  %426 = vmatpush1.msra.mxu0 %v343_v9  ;;  %v334_v18 = vld [vmem:[#allocation6 + $0xf0] sm:$0xff]  ;;  %v332_v19 = vld [vmem:[#allocation6 + $0xe0] sm:$0xff]  ;;  %v333_v20 = vld [vmem:[#allocation6 + $0xe8] sm:$0xff]  ;;  %p1199_p9 = pnand %p1198_p8, %p1422_p7  ;;  %p1205_p13 = scmp.lt.s32.totalorder %s1203_s16, %s1197_s15 }
  0x55   : > { %962 = vmatpush3.msra.mxu1 %v345_v8  ;;  %427 = vmatprep.subr.mxu0 %v341_v10  ;;  %v331_v21 = vld [vmem:[#allocation6 + $0xd8] sm:$0xff]  ;;  %v329_v22 = vld [vmem:[#allocation6 + $0xc8] sm:$0xff]  ;;  %v330_v23 = vld [vmem:[#allocation6 + $0xd0] sm:$0xff] }
  0x56   : > { %963 = vmatprep.subr.mxu1 %v342_v11  ;;  %428 = vmatpush1.msra.mxu0 %v340_v12  ;;  %v328_v24 = vld [vmem:[#allocation6 + $0xc0] sm:$0xff]  ;;  %v326_v25 = vld [vmem:[#allocation6 + $0xb0] sm:$0xff]  ;;  %v327_v26 = vld [vmem:[#allocation6 + $0xb8] sm:$0xff]  ;;  %p1200_p11 = pneg %p1199_p9  ;;  %p1206_p0 = por %p1205_p13, %p1204_p2 }
  0x57   : > { %964 = vmatpush3.msra.mxu1 %v342_v11  ;;  %429 = vmatprep.subr.mxu0 %v338_v13  ;;  %v325_v27 = vld [vmem:[#allocation6 + $0xa8] sm:$0xff]  ;;  %v323_v28 = vld [vmem:[#allocation6 + $0x98] sm:$0xff]  ;;  %v324_v29 = vld [vmem:[#allocation6 + $0xa0] sm:$0xff] }
  0x58   : > { %965 = vmatprep.subr.mxu1 %v339_v14  ;;  %430 = vmatpush1.msra.mxu0 %v337_v15  ;;  %v322_v30 = vld [vmem:[#allocation6 + $0x90] sm:$0xff]  ;;  %v320_v31 = vld [vmem:[#allocation6 + $0x80] sm:$0xff]  ;;  %v321_v32 = vld [vmem:[#allocation6 + $0x88] sm:$0xff]  ;;  %p1207_p5 = pnand %p1206_p0, %p1200_p11 }
  0x59   : > { %966 = vmatpush3.msra.mxu1 %v339_v14  ;;  %431 = vmatprep.subr.mxu0 %v335_v16  ;;  %v319_v33 = vld [vmem:[#allocation6 + $0x78] sm:$0xff]  ;;  %v317_v34 = vld [vmem:[#allocation6 + $0x68] sm:$0xff]  ;;  %v318_v35 = vld [vmem:[#allocation6 + $0x70] sm:$0xff] }
  0x5a   : > { %967 = vmatprep.subr.mxu1 %v336_v17  ;;  %432 = vmatpush1.msra.mxu0 %v334_v18  ;;  %v316_v36 = vld [vmem:[#allocation6 + $0x60] sm:$0xff]  ;;  %v314_v37 = vld [vmem:[#allocation6 + $0x50] sm:$0xff]  ;;  %v315_v38 = vld [vmem:[#allocation6 + $0x58] sm:$0xff] }
  0x5b   : > { %968 = vmatpush3.msra.mxu1 %v336_v17  ;;  %433 = vmatprep.subr.mxu0 %v332_v19  ;;  %v313_v39 = vld [vmem:[#allocation6 + $0x48] sm:$0xff]  ;;  %v311_v40 = vld [vmem:[#allocation6 + $0x38] sm:$0xff]  ;;  %v312_v41 = vld [vmem:[#allocation6 + $0x40] sm:$0xff] }
  0x5c   : > { %969 = vmatprep.subr.mxu1 %v333_v20  ;;  %434 = vmatpush1.msra.mxu0 %v331_v21  ;;  %v310_v42 = vld [vmem:[#allocation6 + $0x30] sm:$0xff]  ;;  %v308_v43 = vld [vmem:[#allocation6 + $0x20] sm:$0xff]  ;;  %v309_v44 = vld [vmem:[#allocation6 + $0x28] sm:$0xff] }
  0x5d   : > { %970 = vmatpush3.msra.mxu1 %v333_v20  ;;  %435 = vmatprep.subr.mxu0 %v329_v22  ;;  %v307_v45 = vld [vmem:[#allocation6 + $0x18] sm:$0xff]  ;;  %v305_v46 = vld [vmem:[#allocation6 + $0x8] sm:$0xff]  ;;  %v306_v47 = vld [vmem:[#allocation6 + $0x10] sm:$0xff] }
  0x5e   : > { %971 = vmatprep.subr.mxu1 %v330_v23  ;;  %436 = vmatpush1.msra.mxu0 %v328_v24  ;;  %v304_v48 = vld [vmem:[#allocation6] sm:$0xff]  ;;  %v404_v50 = vld [vmem:[%s1458_s6 + $0x8] sm:$0xff]  ;;  %v383_v54 = vld [vmem:[#allocation8 + $0xf0] sm:$0xff] }
  0x5f   : > { %972 = vmatpush3.msra.mxu1 %v330_v23  ;;  %437 = vmatprep.subr.mxu0 %v326_v25  ;;  %v403_v49 = vld [vmem:[%s1458_s6] sm:$0xff]  ;;  %v384_v51 = vld [vmem:[#allocation8 + $0xf8] sm:$0xff]  ;;  %v382_v57 = vld [vmem:[#allocation8 + $0xe8] sm:$0xff] }
  0x60   : > { %973 = vmatprep.subr.mxu1 %v327_v26  ;;  %438 = vmatpush1.msra.mxu0 %v325_v27  ;;  %v400_v52 = vld [vmem:[#allocation8 + $0x178] sm:$0xff]  ;;  %v367_v55 = vld [vmem:[#allocation8 + $0x70] sm:$0xff]  ;;  %v366_v58 = vld [vmem:[#allocation8 + $0x68] sm:$0xff] }
  0x61   : > { %974 = vmatpush3.msra.mxu1 %v327_v26  ;;  %439 = vmatprep.subr.mxu0 %v323_v28  ;;  %v368_v53 = vld [vmem:[#allocation8 + $0x78] sm:$0xff]  ;;  %v399_v56 = vld [vmem:[#allocation8 + $0x170] sm:$0xff]  ;;  %v398_v59 = vld [vmem:[#allocation8 + $0x168] sm:$0xff] }
  0x62   : > { %975 = vmatprep.subr.mxu1 %v324_v29  ;;  %440 = vmatpush1.msra.mxu0 %v322_v30  ;;  %v381_v60 = vld [vmem:[#allocation8 + $0xe0] sm:$0xff]  ;;  %v380_v63 = vld [vmem:[#allocation8 + $0xd8] sm:$0xff]  ;;  %v379_v2 = vld [vmem:[#allocation8 + $0xd0] sm:$0xff] }
  0x63   : > { %976 = vmatpush3.msra.mxu1 %v324_v29  ;;  %441 = vmatprep.subr.mxu0 %v320_v31  ;;  %v365_v61 = vld [vmem:[#allocation8 + $0x60] sm:$0xff]  ;;  %v396_v1 = vld [vmem:[#allocation8 + $0x158] sm:$0xff]  ;;  %v363_v3 = vld [vmem:[#allocation8 + $0x50] sm:$0xff] }
  0x64   : > { %977 = vmatprep.subr.mxu1 %v321_v32  ;;  %442 = vmatpush1.msra.mxu0 %v319_v33  ;;  %v397_v62 = vld [vmem:[#allocation8 + $0x160] sm:$0xff]  ;;  %v395_v4 = vld [vmem:[#allocation8 + $0x150] sm:$0xff]  ;;  %v378_v5 = vld [vmem:[#allocation8 + $0xc8] sm:$0xff] }
  0x65   : > { %978 = vmatpush3.msra.mxu1 %v321_v32  ;;  %443 = vmatprep.subr.mxu0 %v317_v34  ;;  %v362_v6 = vld [vmem:[#allocation8 + $0x48] sm:$0xff]  ;;  %v377_v8 = vld [vmem:[#allocation8 + $0xc0] sm:$0xff]  ;;  %v376_v11 = vld [vmem:[#allocation8 + $0xb8] sm:$0xff] }
  0x66   : > { %979 = vmatprep.subr.mxu1 %v318_v35  ;;  %444 = vmatpush1.msra.mxu0 %v316_v36  ;;  %v394_v7 = vld [vmem:[#allocation8 + $0x148] sm:$0xff]  ;;  %v361_v9 = vld [vmem:[#allocation8 + $0x40] sm:$0xff]  ;;  %v360_v12 = vld [vmem:[#allocation8 + $0x38] sm:$0xff] }
  0x67   : > { %980 = vmatpush3.msra.mxu1 %v318_v35  ;;  %445 = vmatprep.subr.mxu0 %v314_v37  ;;  %v393_v10 = vld [vmem:[#allocation8 + $0x140] sm:$0xff]  ;;  %v392_v13 = vld [vmem:[#allocation8 + $0x138] sm:$0xff]  ;;  %v375_v14 = vld [vmem:[#allocation8 + $0xb0] sm:$0xff]  ;;  %v406_v35 = vlaneseq }
  0x68   : > { %981 = vmatprep.subr.mxu1 %v315_v38  ;;  %446 = vmatpush1.msra.mxu0 %v313_v39  ;;  %v359_v15 = vld [vmem:[#allocation8 + $0x30] sm:$0xff]  ;;  %v374_v17 = vld [vmem:[#allocation8 + $0xa8] sm:$0xff]  ;;  %v373_v20 = vld [vmem:[#allocation8 + $0xa0] sm:$0xff] }
  0x69   : > { %982 = vmatpush3.msra.mxu1 %v315_v38  ;;  %447 = vmatprep.subr.mxu0 %v311_v40  ;;  %v391_v16 = vld [vmem:[#allocation8 + $0x130] sm:$0xff]  ;;  %v358_v18 = vld [vmem:[#allocation8 + $0x28] sm:$0xff]  ;;  %v357_v21 = vld [vmem:[#allocation8 + $0x20] sm:$0xff]  ;;  %v407_v36 = vshrl.u32 %v406_v35, 7 }
  0x6a   : > { %983 = vmatprep.subr.mxu1 %v312_v41  ;;  %448 = vmatpush1.msra.mxu0 %v310_v42  ;;  %v390_v19 = vld [vmem:[#allocation8 + $0x128] sm:$0xff]  ;;  %v389_v22 = vld [vmem:[#allocation8 + $0x120] sm:$0xff]  ;;  %v372_v23 = vld [vmem:[#allocation8 + $0x98] sm:$0xff] }
  0x6b   : > { %984 = vmatpush3.msra.mxu1 %v312_v41  ;;  %449 = vmatprep.subr.mxu0 %v308_v43  ;;  %v356_v24 = vld [vmem:[#allocation8 + $0x18] sm:$0xff]  ;;  %v371_v26 = vld [vmem:[#allocation8 + $0x90] sm:$0xff]  ;;  %v370_v29 = vld [vmem:[#allocation8 + $0x88] sm:$0xff]  ;;  %v408_v37 = vsub.s32 0, %v407_v36  ;;  %v416_v38 = vsub.s32 2, %v407_v36  ;;  %v412_v40 = vsub.s32 1, %v407_v36 }
  0x6c   : > { %985 = vmatprep.subr.mxu1 %v309_v44  ;;  %450 = vmatpush1.msra.mxu0 %v307_v45  ;;  %v388_v25 = vld [vmem:[#allocation8 + $0x118] sm:$0xff]  ;;  %v355_v27 = vld [vmem:[#allocation8 + $0x10] sm:$0xff]  ;;  %v354_v30 = vld [vmem:[#allocation8 + $0x8] sm:$0xff] }
  0x6d   : > { %986 = vmatpush3.msra.mxu1 %v309_v44  ;;  %451 = vmatprep.subr.mxu0 %v305_v46  ;;  %v387_v28 = vld [vmem:[#allocation8 + $0x110] sm:$0xff]  ;;  %v386_v31 = vld [vmem:[#allocation8 + $0x108] sm:$0xff]  ;;  %v369_v32 = vld [vmem:[#allocation8 + $0x80] sm:$0xff] }
  0x6e   : > { %987 = vmatprep.subr.mxu1 %v306_v47  ;;  %452 = vmatpush1.msra.mxu0 %v304_v48  ;;  %v353_v33 = vld [vmem:[#allocation8] sm:$0xff] }
  0x6f   : > { %988 = vmatpush3.msra.mxu1 %v306_v47  ;;  %486 = vmatmul.mubr.f32.vlgmr.msra.gmra.mxu0 %v403_v49  ;;  %v385_v34 = vld [vmem:[#allocation8 + $0x100] sm:$0xff] }
  0x70   : > { %989 = vmatprep.mubr.f32.mxu1 %v403_v49  ;;  %491 = vmatprep.mubr.f32.mxu0 %v1290_v0  ;;  %v364_v0 = vld [vmem:[#allocation8 + $0x58] sm:$0xff]  ;;  %v402_v39 = vld [vmem:[%s1536_s2] sm:$0x7] }
  0x71   : > { %990 = vmatmul.mubr.f32.vlgmr.msra.gmra.mxu1 %v404_v50  ;;  %901 = vmatprep.subr.mxu0 %v384_v51  ;;  %v409_v41 = vrot.slane %v402_v39, %v408_v37  ;;  %v417_v42 = vrot.slane %v402_v39, %v416_v38  ;;  %v413_v43 = vrot.slane %v402_v39, %v412_v40 }
  0x72   : > { %992 = vmatprep.subr.mxu1 %v400_v52  ;;  %902 = vmatpush3.msra.mxu0 %v368_v53 }
  0x73   : > { %993 = vmatpush3.msra.mxu1 %v400_v52  ;;  %492 = vmatmul.mubr.f32.gmra.mxu0 %v404_v50 }
  0x74   : > { %903 = vmatprep.subr.mxu0 %v383_v54  ;;  %994 = vmatprep.subr.mxu1 %v399_v56 }
  0x75   : > { %904 = vmatpush3.msra.mxu0 %v367_v55  ;;  %995 = vmatpush3.msra.mxu1 %v399_v56 }
  0x76   : > { %905 = vmatprep.subr.mxu0 %v382_v57  ;;  %996 = vmatprep.subr.mxu1 %v398_v59 }
  0x77   : > { %906 = vmatpush3.msra.mxu0 %v366_v58  ;;  %997 = vmatpush3.msra.mxu1 %v398_v59 }
  0x78   : > { %907 = vmatprep.subr.mxu0 %v381_v60  ;;  %998 = vmatprep.subr.mxu1 %v397_v62 }
  0x79   : > { %908 = vmatpush3.msra.mxu0 %v365_v61  ;;  %999 = vmatpush3.msra.mxu1 %v397_v62 }
  0x7a   : > { %909 = vmatprep.subr.mxu0 %v380_v63  ;;  %1000 = vmatprep.subr.mxu1 %v396_v1 }
  0x7b   : > { %910 = vmatpush3.msra.mxu0 %v364_v0  ;;  %1001 = vmatpush3.msra.mxu1 %v396_v1 }
  0x7c   : > { %911 = vmatprep.subr.mxu0 %v379_v2  ;;  %1002 = vmatprep.subr.mxu1 %v395_v4 }
  0x7d   : > { %912 = vmatpush3.msra.mxu0 %v363_v3  ;;  %1003 = vmatpush3.msra.mxu1 %v395_v4  ;;  %v875_v3 = vld [vmem:[%s1538_s4] ss:$0 sm:$0xff] }
  0x7e   : > { %913 = vmatprep.subr.mxu0 %v378_v5  ;;  %1004 = vmatprep.subr.mxu1 %v394_v7 }
  0x7f   : > { %914 = vmatpush3.msra.mxu0 %v362_v6  ;;  %1005 = vmatpush3.msra.mxu1 %v394_v7 }
  0x80   : > { %915 = vmatprep.subr.mxu0 %v377_v8  ;;  %1006 = vmatprep.subr.mxu1 %v393_v10 }
  0x81   : > { %916 = vmatpush3.msra.mxu0 %v361_v9  ;;  %1007 = vmatpush3.msra.mxu1 %v393_v10 }
  0x82   : > { %917 = vmatprep.subr.mxu0 %v376_v11  ;;  %1008 = vmatprep.subr.mxu1 %v392_v13 }
  0x83   : > { %918 = vmatpush3.msra.mxu0 %v360_v12  ;;  %1009 = vmatpush3.msra.mxu1 %v392_v13 }
  0x84   : > { %919 = vmatprep.subr.mxu0 %v375_v14  ;;  %1010 = vmatprep.subr.mxu1 %v391_v16 }
  0x85   : > { %920 = vmatpush3.msra.mxu0 %v359_v15  ;;  %1011 = vmatpush3.msra.mxu1 %v391_v16 }
  0x86   : > { %921 = vmatprep.subr.mxu0 %v374_v17  ;;  %1012 = vmatprep.subr.mxu1 %v390_v19 }
  0x87   : > { %922 = vmatpush3.msra.mxu0 %v358_v18  ;;  %1013 = vmatpush3.msra.mxu1 %v390_v19 }
  0x88   : > { %923 = vmatprep.subr.mxu0 %v373_v20  ;;  %1014 = vmatprep.subr.mxu1 %v389_v22 }
  0x89   : > { %924 = vmatpush3.msra.mxu0 %v357_v21  ;;  %1015 = vmatpush3.msra.mxu1 %v389_v22 }
  0x8a   : > { %925 = vmatprep.subr.mxu0 %v372_v23  ;;  %1016 = vmatprep.subr.mxu1 %v388_v25 }
  0x8b   : > { %926 = vmatpush3.msra.mxu0 %v356_v24  ;;  %1017 = vmatpush3.msra.mxu1 %v388_v25 }
  0x8c   : > { %927 = vmatprep.subr.mxu0 %v371_v26  ;;  %1018 = vmatprep.subr.mxu1 %v387_v28 }
  0x8d   : > { %928 = vmatpush3.msra.mxu0 %v355_v27  ;;  %1019 = vmatpush3.msra.mxu1 %v387_v28 }
  0x8e   : > { %929 = vmatprep.subr.mxu0 %v370_v29  ;;  %1020 = vmatprep.subr.mxu1 %v386_v31 }
  0x8f   : > { %930 = vmatpush3.msra.mxu0 %v354_v30  ;;  %1021 = vmatpush3.msra.mxu1 %v386_v31 }
  0x90   : > { %931 = vmatprep.subr.mxu0 %v369_v32  ;;  %1022 = vmatprep.subr.mxu1 %v385_v34 }
  0x91   : > { %932 = vmatpush3.msra.mxu0 %v353_v33  ;;  %1023 = vmatpush3.msra.mxu1 %v385_v34 }
 0x12f   : > { %v487_v44 = vpop.f32.mrf.mxu0 }
 0x130   : > { %v488_v46 = vadd.f32 %v487_v44, %v409_v41 }
 0x131   : > { %v991_v45 = vpop.f32.mrf.mxu1  ;;  %v489_v48 = vpop.f32.mrf.mxu0 }
 0x132   : > { %v570_v47 = vadd.f32 %v991_v45, %v417_v42  ;;  %v490_v49 = vadd.f32 %v489_v48, %v413_v43  ;;  %v573_v55 = vmax.f32 %v488_v46, 0.0 }
 0x133   : > { %v564_v50 = vpop.f32.mrf.mxu1  ;;  %v493_v52 = vpop.f32.mrf.mxu0 }
 0x134   : > { %v565_v51 = vadd.f32 %v564_v50, %v417_v42  ;;  %v578_v53 = vmax.f32 %v570_v47, 0.0  ;;  %v574_v54 = vmax.f32 %v490_v49, 0.0  ;;  %v494_v57 = vadd.f32 %v493_v52, %v409_v41 }
 0x135   : > { %v495_v58 = vpop.f32.mrf.mxu0 }
 0x136   : > { %v575_v56 = vmax.f32 %v565_v51, 0.0  ;;  %v496_v59 = vadd.f32 %v495_v58, %v413_v43  ;;  %645 = vmatprep.mubr.f32.mxu0 %v574_v54  ;;  %v576_v61 = vmax.f32 %v494_v57, 0.0 }
 0x137   : > { %646 = vmatmul.mubr.f32.vlgmr.msra.gmra.mxu0 %v573_v55 }
 0x138   : > { %1024 = vmatprep.mubr.f32.mxu1 %v575_v56  ;;  %v577_v60 = vmax.f32 %v496_v59, 0.0 }
 0x139   : > { %1025 = vmatmul.mubr.f32.vlgmr.msra.gmra.mxu1 %v578_v53 }
 0x13a   : > { %650 = vmatprep.mubr.f32.mxu0 %v577_v60 }
 0x13b   : > { %651 = vmatmul.mubr.f32.gmra.mxu0 %v576_v61 }
 0x1f7   : > { %v933_v62 = vpop.f32.mrf.mxu0 }
 0x1f9   : > { %v1026_v63 = vpop.f32.mrf.mxu1  ;;  %v934_v0 = vpop.f32.mrf.mxu0 }
 0x1fa   : > { %v935_v1 = vadd.f32 %v934_v0, %v933_v62 }
 0x1fb   : > { %v722_v2 = vpop.f32.mrf.mxu1  ;;  %v936_v4 = vpop.f32.mrf.mxu0 }
 0x1fc   : > { %v723_v5 = vadd.f32 %v935_v1, %v722_v2 }
 0x1fd   : > { %v937_v6 = vpop.f32.mrf.mxu0 }
 0x1fe   : > { %v731_v7 = vadd.f32 %v875_v3, %v723_v5  ;;  %v938_v8 = vadd.f32 %v937_v6, %v936_v4 }
 0x200   : > { %740 = vst [vmem:[%s283_s24] sm:$0xff] %v731_v7  ;;  %v728_v9 = vadd.f32 %v1026_v63, %v938_v8 }
 0x202   : > { %v732_v10 = vadd.f32 %v875_v3, %v728_v9 }
 0x204   : > { %741 = vst [vmem:[%s283_s24 + $0x8] sm:$0xff] %v732_v10 }
 0x205   : > { %1210 = shalt.err (!%p1207_p5)
}
 0x206   : > { %s1211_s6 = scalar_lea.hbm %s1486_s13, 256  ;;  %s1215_s30 = scalar_lea.hbm %s1539_s5, 512 }
 0x207   : > { %p1212_p10 = scmp.ne.s32.totalorder %s1486_s13, %s1211_s6  ;;  %p1216_p6 = scmp.lt.s32.totalorder %s1486_s13, %s1539_s5 }
 0x208   : > { %p1217_p12 = scmp.lt.s32.totalorder %s1215_s30, %s1211_s6 }
 0x209   : > { %p1213_p1 = pnand %p1212_p10, %p1422_p7 }
 0x20a   : > { %p1218_p3 = por %p1217_p12, %p1216_p6 }
 0x20b   : > { %p1214_p4 = pneg %p1213_p1 }
 0x20d   : > { %p1219_p8 = pnand %p1218_p3, %p1214_p4 }
 0x20f   : > { %1222 = shalt.err (!%p1219_p8)
}
 0x210   : > { %s1292_s27 = smov 128   ;;  %s1293_s11 = smov 8  }
 0x211   : > { %1037 = dma.vmem_to_hbm [thread:$0]  (%p1422_p7), %s1481_s25, 256, %s1486_s13, %s743_s10, %s1292_s27, %s1292_s27, %s1293_s11  }
 0x212 PF: > { %s771_s9 = sand.u32 1, %s1261_s18   ;;  %p1559_p9 = scmp.ne.s32.totalorder %s1549_s29, 0 }
 0x213   : > { %p1560_p11 = scmp.ge.s32.totalorder %s1281_s23, 2  ;;  %s772_s15 = scalar_lea.sflag [#allocation5], %s771_s9 }
 0x215   : > { %p1051_p2 = pnand %p1560_p11, %p1559_p9 }
 0x217   : > { %p1052_p13 = pneg %p1051_p2 }
 0x219   : > { %1256 = dma.done.wait (%p1052_p13), %s772_s15, 256  }
 0x21a   : > { %1258 = vsyncadd (%p1052_p13), %s772_s15, 4294967040  ;;  %s22_s23 = sadd.s32 1, %s1281_s23   ;;  %s1561_s18 = smov %s1265_s19 }
 0x21b   : > { %p19_p0 = scmp.ge.s32.totalorder %s22_s23, 4   ;;  %s1562_s19 = smov %s1269_s20 }
 0x21c   : > { %s1563_s20 = smov %s1431_s14  ;;  %s1564_s21 = smov %s1277_s22 }
 0x21d   : > { %s1565_s22 = smov %s1567_s7  ;;  %21 = sbr.rel (!%p19_p0) target bundleno = 9 (0x9), region = 104 }
 0x222   :  { %777 = vsyncpa [#allocation4], 1 }
 0x223   :  { %779 = vsyncpa [#allocation4 + $0x1], 1 }
 0x224   :  { %780 = vsyncpa [#allocation7], 1 }
 0x225   :  { %781 = vsyncpa [#allocation5], 1 }
 0x226   :  { %783 = vsyncpa [#allocation5 + $0x1], 1 }

</bundles_post_ra>
